<compile_context>
chip_gen: v7x
topology: tpu7x:2x2x1
jax: 0.10.0
libtpu: 0.0.40
codegen_flags: <defaults>
</compile_context>

<pallas_src>
import jax
import jax.numpy as jnp
from jax.experimental import pallas as pl
from jax.experimental.pallas import tpu as pltpu


def outblock_critic_kernel(x_ref, w_eff_ref, w1_ref, b1_ref, w2_ref,
                           b_eff_ref, b2_ref, out_ref):
    # x_ref:     (TB, 256, 64) VMEM     w_eff_ref: (1, 1, 256) VMEM
    # w1_ref:    (64, 64)      VMEM     b1_ref:    (1, 64)     VMEM
    # w2_ref:    (1, 64)       VMEM
    # b_eff_ref: (1,) SMEM              b2_ref:    (1,) SMEM
    # out_ref:   (1, TB)       VMEM
    x = x_ref[...].astype(jnp.float32)                      # (TB, 256, 64)
    tb = x.shape[0]

    # 1x1 conv (256 -> 1) with BN pre-folded, as a batched MXU matmul:
    # (TB, 1, 256) @ (TB, 256, 64) -> (TB, 1, 64)
    w_b = jnp.broadcast_to(w_eff_ref[...], (tb, 1, 256))
    v = jnp.einsum("bmk,bkn->bmn", w_b, x,
                   preferred_element_type=jnp.float32)      # (TB, 1, 64)
    v = v[:, 0, :] + b_eff_ref[0]                           # (TB, 64)
    v = jnp.maximum(v, 0.0)                                 # ReLU

    # fc1: (TB, 64) @ (64, 64) + b1, ReLU
    h = jnp.dot(v, w1_ref[...], preferred_element_type=jnp.float32)
    h = jnp.maximum(h + b1_ref[...], 0.0)                   # (TB, 64)

    # fc2, emitted directly in lane-dense (1, TB) layout:
    # (1, 64) x (TB, 64) contracting k -> (1, TB)
    y = jnp.einsum("ok,bk->ob", w2_ref[...], h,
                   preferred_element_type=jnp.float32)
    out_ref[...] = jnp.tanh(y + b2_ref[0]).astype(out_ref.dtype)


def outblock_critic(x_nchw, params, *, block_b=128,
                    vmem_limit_bytes=48 * 1024 * 1024):
    """x_nchw: (B, 256, 8, 8). Returns (B, 1) float32.

    block_b: batch tile. 128 (8 MiB/x-buffer) is safe on v5e/v6e/v7x with the
    given vmem_limit; on v6e/v5e (128 MiB physical VMEM) 256-512 amortizes the
    per-grid-step overhead further.
    """
    B, C, H, W = x_nchw.shape
    assert C == 256 and H * W == 64
    x = x_nchw.reshape(B, C, H * W)                          # (B, 256, 64)

    eps = 1e-5
    bn_scale = params["bn_gamma"] / jnp.sqrt(params["bn_var"] + eps)   # (1,)
    # Fold inference-mode BN into the 1x1 conv:  w_eff = w*s,
    # b_eff = s*(conv_b - mean) + beta
    w_eff = (params["conv_w"].reshape(1, 1, 256) * bn_scale[0]
             ).astype(jnp.float32)
    b_eff = (bn_scale * (params["conv_b"] - params["bn_mean"])
             + params["bn_beta"]).reshape(1).astype(jnp.float32)

    w1_t = params["fc1_w"].T.astype(jnp.float32)             # (64, 64)
    b1 = params["fc1_b"].reshape(1, 64).astype(jnp.float32)
    w2 = params["fc2_w"].reshape(1, 64).astype(jnp.float32)  # torch layout
    b2 = params["fc2_b"].reshape(1).astype(jnp.float32)

    TB = min(block_b, B)                                     # TB==B or TB%128==0
    grid = (pl.cdiv(B, TB),)

    itemsize = jnp.dtype(x.dtype).itemsize
    cost = pl.CostEstimate(
        flops=2 * B * (256 * 64 + 64 * 64 + 64),
        transcendentals=B,
        bytes_accessed=(B * 256 * 64 * itemsize
                        + 4 * (256 + 64 * 64 + 64 + 64 + 2)
                        + B * 4),
    )

    out = pl.pallas_call(
        outblock_critic_kernel,
        out_shape=jax.ShapeDtypeStruct((1, B), jnp.float32),
        grid=grid,
        in_specs=[
            pl.BlockSpec((TB, C, H * W), lambda i: (i, 0, 0)),   # x (tiled)
            pl.BlockSpec((1, 1, 256), lambda i: (0, 0, 0)),      # conv w (BN folded)
            pl.BlockSpec((64, 64), lambda i: (0, 0)),            # fc1 W^T
            pl.BlockSpec((1, 64), lambda i: (0, 0)),             # fc1 b
            pl.BlockSpec((1, 64), lambda i: (0, 0)),             # fc2 W
            pl.BlockSpec(memory_space=pltpu.MemorySpace.SMEM),   # b_eff scalar
            pl.BlockSpec(memory_space=pltpu.MemorySpace.SMEM),   # fc2 b scalar
        ],
        out_specs=pl.BlockSpec((1, TB), lambda i: (0, i)),
        compiler_params=pltpu.CompilerParams(
            dimension_semantics=("parallel",),
            vmem_limit_bytes=vmem_limit_bytes),
        cost_estimate=cost,
    )(x, w_eff, w1_t, b1, w2, b_eff, b2)
    return out.reshape(B, 1)


def reference(x_nchw, params):
    """Pure-JAX reference of the same (inference-mode BN) forward pass."""
    B = x_nchw.shape[0]
    x = x_nchw.reshape(B, 256, 64)
    v = jnp.einsum("bcf,c->bf", x, params["conv_w"].reshape(256)) + params["conv_b"]
    eps = 1e-5
    v = (v - params["bn_mean"]) / jnp.sqrt(params["bn_var"] + eps)
    v = v * params["bn_gamma"] + params["bn_beta"]
    v = jax.nn.relu(v)
    v = jax.nn.relu(v @ params["fc1_w"].T + params["fc1_b"])
    v = jnp.tanh(v @ params["fc2_w"].T + params["fc2_b"])
    return v


def make_params(key):
    ks = jax.random.split(key, 6)
    return {
        # nn.Conv2d(256, 1, 1): weight (1, 256, 1, 1), bias (1,)
        "conv_w": jax.random.normal(ks[0], (1, 256, 1, 1), jnp.float32) * 0.05,
        "conv_b": jax.random.normal(ks[1], (1,), jnp.float32) * 0.05,
        # nn.BatchNorm2d(1) — inference-mode parameters / running stats
        "bn_gamma": jnp.array([1.3], jnp.float32),
        "bn_beta": jnp.array([0.1], jnp.float32),
        "bn_mean": jnp.array([0.05], jnp.float32),
        "bn_var": jnp.array([0.8], jnp.float32),
        # nn.Linear(64, 64)
        "fc1_w": jax.random.normal(ks[2], (64, 64), jnp.float32) * 0.1,
        "fc1_b": jax.random.normal(ks[3], (64,), jnp.float32) * 0.1,
        # nn.Linear(64, 1)
        "fc2_w": jax.random.normal(ks[4], (1, 64), jnp.float32) * 0.1,
        "fc2_b": jax.random.normal(ks[5], (1,), jnp.float32) * 0.1,
    }


if __name__ == "__main__":
    key = jax.random.PRNGKey(0)
    k_x, k_p = jax.random.split(key)
    B = 2
    x = jax.random.normal(k_x, (B, 256, 8, 8), jnp.float32)
    params = make_params(k_p)

    out = outblock_critic(x, params)
    out = jax.block_until_ready(out)

    ref = reference(x, params)
    assert out.shape == (B, 1)
    assert jnp.allclose(out, ref, atol=1e-4, rtol=1e-4), (out, ref)
    print("KERNEL_OK")
</pallas_src>

<mosaic_0001>
module attributes {stable_mosaic.version = 11 : i64} {
  func.func @outblock_critic_kernel(%arg0: i32, %arg1: memref<2x256x64xf32, #tpu.memory_space<vmem>>, %arg2: memref<1x1x256xf32, #tpu.memory_space<vmem>>, %arg3: memref<64x64xf32, #tpu.memory_space<vmem>>, %arg4: memref<1x64xf32, #tpu.memory_space<vmem>>, %arg5: memref<1x64xf32, #tpu.memory_space<vmem>>, %arg6: memref<1xf32, #tpu.memory_space<smem>>, %arg7: memref<1xf32, #tpu.memory_space<smem>>, %arg8: memref<1x2xf32, #tpu.memory_space<vmem>>) attributes {dimension_semantics = [#tpu.dimension_semantics<parallel>], iteration_bounds = array<i64: 1>, scalar_prefetch = 0 : i64, scratch_operands = 0 : i64, tpu.core_type = #tpu.core_type<tc>, window_params = [{transform_indices = @transform_0, window_bounds = array<i64: 2, 256, 64>}, {pipeline_mode = #tpu.pipeline_mode<synchronous>, transform_indices = @transform_1, window_bounds = array<i64: 1, 1, 256>}, {pipeline_mode = #tpu.pipeline_mode<synchronous>, transform_indices = @transform_2, window_bounds = array<i64: 64, 64>}, {pipeline_mode = #tpu.pipeline_mode<synchronous>, transform_indices = @transform_3, window_bounds = array<i64: 1, 64>}, {pipeline_mode = #tpu.pipeline_mode<synchronous>, transform_indices = @transform_4, window_bounds = array<i64: 1, 64>}, {transform_indices = @transform_5, window_bounds = array<i64: 1>}, {transform_indices = @transform_6, window_bounds = array<i64: 1>}, {transform_indices = @transform_7, window_bounds = array<i64: 1, 2>}]} {
    %c0 = arith.constant 0 : index
    %c0_0 = arith.constant 0 : index
    %c0_1 = arith.constant 0 : index
    %0 = vector.load %arg1[%c0, %c0_0, %c0_1] : memref<2x256x64xf32, #tpu.memory_space<vmem>>, vector<2x256x64xf32>
    %c0_2 = arith.constant 0 : index
    %c0_3 = arith.constant 0 : index
    %c0_4 = arith.constant 0 : index
    %1 = vector.load %arg2[%c0_2, %c0_3, %c0_4] : memref<1x1x256xf32, #tpu.memory_space<vmem>>, vector<1x1x256xf32>
    %2 = vector.shape_cast %1 : vector<1x1x256xf32> to vector<1x1x256xf32>
    %3 = vector.broadcast %2 : vector<1x1x256xf32> to vector<2x1x256xf32>
    "tpu.trace_start"() <{level = 10 : i32, message = "bmk,bkn->bmn"}> : () -> ()
    %cst = arith.constant dense<0.000000e+00> : vector<2x1x64xf32>
    %4 = tpu.matmul %3, %0, %cst {dimension_numbers = #tpu.dot_dimension_numbers<[2], [1], [1], [2], [0, 0, 0, 1, 1, 2], [0], [0]>} : vector<2x1x256xf32>, vector<2x256x64xf32>, vector<2x1x64xf32> -> vector<2x1x64xf32>
    "tpu.trace_stop"() : () -> ()
    %5 = vector.shape_cast %4 : vector<2x1x64xf32> to vector<2x64xf32>
    %c0_5 = arith.constant 0 : index
    %6 = memref.load %arg6[%c0_5] : memref<1xf32, #tpu.memory_space<smem>>
    %7 = vector.broadcast %6 : f32 to vector<2x64xf32>
    %8 = arith.addf %5, %7 : vector<2x64xf32>
    %cst_6 = arith.constant 0.000000e+00 : f32
    %9 = vector.broadcast %cst_6 : f32 to vector<2x64xf32>
    %10 = arith.maximumf %8, %9 : vector<2x64xf32>
    %c0_7 = arith.constant 0 : index
    %c0_8 = arith.constant 0 : index
    %11 = vector.load %arg3[%c0_7, %c0_8] : memref<64x64xf32, #tpu.memory_space<vmem>>, vector<64x64xf32>
    %cst_9 = arith.constant dense<0.000000e+00> : vector<2x64xf32>
    %12 = tpu.matmul %10, %11, %cst_9 {dimension_numbers = #tpu.dot_dimension_numbers<[1], [0], [0], [1], [0, 0, 1, 1], [], []>} : vector<2x64xf32>, vector<64x64xf32>, vector<2x64xf32> -> vector<2x64xf32>
    %c0_10 = arith.constant 0 : index
    %c0_11 = arith.constant 0 : index
    %13 = vector.load %arg4[%c0_10, %c0_11] : memref<1x64xf32, #tpu.memory_space<vmem>>, vector<1x64xf32>
    %14 = vector.broadcast %13 : vector<1x64xf32> to vector<2x64xf32>
    %15 = arith.addf %12, %14 : vector<2x64xf32>
    %cst_12 = arith.constant 0.000000e+00 : f32
    %16 = vector.broadcast %cst_12 : f32 to vector<2x64xf32>
    %17 = arith.maximumf %15, %16 : vector<2x64xf32>
    %c0_13 = arith.constant 0 : index
    %c0_14 = arith.constant 0 : index
    %18 = vector.load %arg5[%c0_13, %c0_14] : memref<1x64xf32, #tpu.memory_space<vmem>>, vector<1x64xf32>
    "tpu.trace_start"() <{level = 10 : i32, message = "ok,bk->ob"}> : () -> ()
    %cst_15 = arith.constant dense<0.000000e+00> : vector<1x2xf32>
    %19 = tpu.matmul %18, %17, %cst_15 {dimension_numbers = #tpu.dot_dimension_numbers<[1], [1], [0], [0], [0, 0, 1, 0], [], []>} : vector<1x64xf32>, vector<2x64xf32>, vector<1x2xf32> -> vector<1x2xf32>
    "tpu.trace_stop"() : () -> ()
    %c0_16 = arith.constant 0 : index
    %20 = memref.load %arg7[%c0_16] : memref<1xf32, #tpu.memory_space<smem>>
    %21 = vector.broadcast %20 : f32 to vector<1x2xf32>
    %22 = arith.addf %19, %21 : vector<1x2xf32>
    %23 = math.tanh %22 : vector<1x2xf32>
    %c0_17 = arith.constant 0 : index
    %c0_18 = arith.constant 0 : index
    %24 = vector.load %arg8[%c0_17, %c0_18] : memref<1x2xf32, #tpu.memory_space<vmem>>, vector<1x2xf32>
    tpu.vector_store %arg8[%c0_17, %c0_18], %23 {strides = array<i32>} : memref<1x2xf32, #tpu.memory_space<vmem>>, vector<1x2xf32>,
    return
  }
  func.func @transform_0(%arg0: i32) -> (i32, i32, i32) {
    %c0_i32 = arith.constant 0 : i32
    %c0_i32_0 = arith.constant 0 : i32
    %c0_i32_1 = arith.constant 0 : i32
    return %arg0, %c0_i32, %c0_i32_0 : i32, i32, i32
  }
  func.func @transform_1(%arg0: i32) -> (i32, i32, i32) {
    %c0_i32 = arith.constant 0 : i32
    %c0_i32_0 = arith.constant 0 : i32
    %c0_i32_1 = arith.constant 0 : i32
    %c0_i32_2 = arith.constant 0 : i32
    return %c0_i32, %c0_i32_0, %c0_i32_1 : i32, i32, i32
  }
  func.func @transform_2(%arg0: i32) -> (i32, i32) {
    %c0_i32 = arith.constant 0 : i32
    %c0_i32_0 = arith.constant 0 : i32
    %c0_i32_1 = arith.constant 0 : i32
    return %c0_i32, %c0_i32_0 : i32, i32
  }
  func.func @transform_3(%arg0: i32) -> (i32, i32) {
    %c0_i32 = arith.constant 0 : i32
    %c0_i32_0 = arith.constant 0 : i32
    %c0_i32_1 = arith.constant 0 : i32
    return %c0_i32, %c0_i32_0 : i32, i32
  }
  func.func @transform_4(%arg0: i32) -> (i32, i32) {
    %c0_i32 = arith.constant 0 : i32
    %c0_i32_0 = arith.constant 0 : i32
    %c0_i32_1 = arith.constant 0 : i32
    return %c0_i32, %c0_i32_0 : i32, i32
  }
  func.func @transform_5(%arg0: i32) -> i32 {
    %c0_i32 = arith.constant 0 : i32
    %c0_i32_0 = arith.constant 0 : i32
    return %c0_i32 : i32
  }
  func.func @transform_6(%arg0: i32) -> i32 {
    %c0_i32 = arith.constant 0 : i32
    %c0_i32_0 = arith.constant 0 : i32
    return %c0_i32 : i32
  }
  func.func @transform_7(%arg0: i32) -> (i32, i32) {
    %c0_i32 = arith.constant 0 : i32
    %c0_i32_0 = arith.constant 0 : i32
    return %c0_i32, %arg0 : i32, i32
  }
}

</mosaic_0001>

<bundles_post_ra>
// kernel: tpu_custom_call.1
= control target key start
LH: loop header
LB: loop body
LE: loop exit
PB: predicated region body
PF: predicated region fallthrough
CT: control target
= control target key end

     0   :  { %v95_v47 = vlaneseq  ;;  %s947_s0 = inlined_call_operand.vmem [shape: f32[2,256,64], index: 0, kind: input, shape index: {}]   ;;  %s948_s1 = inlined_call_operand.vmem [shape: f32[1,1,256], index: 1, kind: input, shape index: {}]   ;;  %s949_s2 = inlined_call_operand.vmem [shape: f32[64,64], index: 2, kind: input, shape index: {}]   ;;  %s950_s3 = inlined_call_operand.vmem [shape: f32[1,64], index: 3, kind: input, shape index: {}]   ;;  %s951_s4 = inlined_call_operand.vmem [shape: f32[1,64], index: 4, kind: input, shape index: {}]   ;;  %s952_s5 = inlined_call_operand.<no memory space> [shape: f32[1], index: 5, kind: input, shape index: {}]   ;;  %s953_s6 = inlined_call_operand.<no memory space> [shape: f32[1], index: 6, kind: input, shape index: {}]   ;;  %s954_s7 = inlined_call_operand.hbm [shape: f32[1,2], index: 7, kind: output, shape index: {}]  }
   0x1   :  { %v77_v0 = vld [vmem:[%s947_s0 + $0x180] sm:$0xff]  ;;  %v78_v1 = vld [vmem:[%s947_s0 + $0x188] sm:$0xff]  ;;  %v79_v11 = vld [vmem:[%s947_s0 + $0x190] sm:$0xff] }
   0x2   :  { %v45_v2 = vld [vmem:[%s947_s0 + $0x80] sm:$0xff]  ;;  %v582_v3 = vpack.c.bf16 %v78_v1, %v77_v0  ;;  %v46_v4 = vld [vmem:[%s947_s0 + $0x88] sm:$0xff]  ;;  %v80_v13 = vld [vmem:[%s947_s0 + $0x198] sm:$0xff]  ;;  %v826_v61 = vshrl.u32 %v95_v47, 7 }
   0x3   :  { %v61_v5 = vld [vmem:[%s947_s0 + $0x100] sm:$0xff]  ;;  %v62_v6 = vld [vmem:[%s947_s0 + $0x108] sm:$0xff]  ;;  %v550_v7 = vpack.c.bf16 %v46_v4, %v45_v2  ;;  %v47_v14 = vld [vmem:[%s947_s0 + $0x90] sm:$0xff]  ;;  %v586_v16 = vpack.c.bf16 %v80_v13, %v79_v11 }
   0x4   :  { %v584_v8 = vpack.c.bf16 %v62_v6, %v61_v5  ;;  %v29_v9 = vld [vmem:[%s947_s0] sm:$0xff]  ;;  %v30_v10 = vld [vmem:[%s947_s0 + $0x8] sm:$0xff]  ;;  %583 = vmatprep.subr.bf16.mxu1 %v582_v3  ;;  %v48_v15 = vld [vmem:[%s947_s0 + $0x98] sm:$0xff] }
   0x5   :  { %v552_v12 = vpack.c.bf16 %v30_v10, %v29_v9  ;;  %551 = vmatprep.subr.bf16.mxu0 %v550_v7  ;;  %v554_v17 = vpack.c.bf16 %v48_v15, %v47_v14  ;;  %v63_v18 = vld [vmem:[%s947_s0 + $0x110] sm:$0xff]  ;;  %v64_v19 = vld [vmem:[%s947_s0 + $0x118] sm:$0xff]  ;;  %v81_v23 = vld [vmem:[%s947_s0 + $0x1a0] sm:$0xff]  ;;  %v101_v10 = vsub.s32 1, %v826_v61 }
   0x6   :  { %585 = vmatpush3.bf16.msra.mxu1 %v584_v8  ;;  %v31_v20 = vld [vmem:[%s947_s0 + $0x10] sm:$0xff]  ;;  %v588_v21 = vpack.c.bf16 %v64_v19, %v63_v18  ;;  %v32_v22 = vld [vmem:[%s947_s0 + $0x18] sm:$0xff]  ;;  %v82_v24 = vld [vmem:[%s947_s0 + $0x1a8] sm:$0xff] }
   0x7   :  { %553 = vmatpush3.bf16.msra.mxu0 %v552_v12  ;;  %587 = vmatprep.subr.bf16.mxu1 %v586_v16  ;;  %v556_v25 = vpack.c.bf16 %v32_v22, %v31_v20  ;;  %v590_v26 = vpack.c.bf16 %v82_v24, %v81_v23  ;;  %v49_v27 = vld [vmem:[%s947_s0 + $0xa0] sm:$0xff]  ;;  %v50_v28 = vld [vmem:[%s947_s0 + $0xa8] sm:$0xff]  ;;  %v83_v35 = vld [vmem:[%s947_s0 + $0x1b0] sm:$0xff] }
   0x8   :  { %555 = vmatprep.subr.bf16.mxu0 %v554_v17  ;;  %v65_v29 = vld [vmem:[%s947_s0 + $0x120] sm:$0xff]  ;;  %v558_v30 = vpack.c.bf16 %v50_v28, %v49_v27  ;;  %v66_v31 = vld [vmem:[%s947_s0 + $0x128] sm:$0xff]  ;;  %v84_v36 = vld [vmem:[%s947_s0 + $0x1b8] sm:$0xff] }
   0x9   :  { %v33_v32 = vld [vmem:[%s947_s0 + $0x20] sm:$0xff]  ;;  %v34_v33 = vld [vmem:[%s947_s0 + $0x28] sm:$0xff]  ;;  %v592_v34 = vpack.c.bf16 %v66_v31, %v65_v29  ;;  %v51_v37 = vld [vmem:[%s947_s0 + $0xb0] sm:$0xff]  ;;  %v594_v39 = vpack.c.bf16 %v84_v36, %v83_v35 }
   0xa   :  { %589 = vmatpush3.bf16.msra.mxu1 %v588_v21  ;;  %v560_v38 = vpack.c.bf16 %v34_v33, %v33_v32  ;;  %v52_v40 = vld [vmem:[%s947_s0 + $0xb8] sm:$0xff]  ;;  %v67_v41 = vld [vmem:[%s947_s0 + $0x130] sm:$0xff]  ;;  %v85_v46 = vld [vmem:[%s947_s0 + $0x1c0] sm:$0xff] }
   0xb   :  { %557 = vmatpush3.bf16.msra.mxu0 %v556_v25  ;;  %591 = vmatprep.subr.bf16.mxu1 %v590_v26  ;;  %v68_v42 = vld [vmem:[%s947_s0 + $0x138] sm:$0xff]  ;;  %v562_v43 = vpack.c.bf16 %v52_v40, %v51_v37  ;;  %v35_v44 = vld [vmem:[%s947_s0 + $0x30] sm:$0xff]  ;;  %v86_v48 = vld [vmem:[%s947_s0 + $0x1c8] sm:$0xff] }
   0xc   :  { %559 = vmatprep.subr.bf16.mxu0 %v558_v30  ;;  %v36_v45 = vld [vmem:[%s947_s0 + $0x38] sm:$0xff]  ;;  %v53_v49 = vld [vmem:[%s947_s0 + $0xc0] sm:$0xff]  ;;  %v54_v50 = vld [vmem:[%s947_s0 + $0xc8] sm:$0xff]  ;;  %v596_v51 = vpack.c.bf16 %v68_v42, %v67_v41  ;;  %v598_v53 = vpack.c.bf16 %v86_v48, %v85_v46 }
   0xd   :  { %v564_v52 = vpack.c.bf16 %v36_v45, %v35_v44  ;;  %v69_v54 = vld [vmem:[%s947_s0 + $0x140] sm:$0xff]  ;;  %v70_v55 = vld [vmem:[%s947_s0 + $0x148] sm:$0xff]  ;;  %v566_v57 = vpack.c.bf16 %v54_v50, %v53_v49  ;;  %v87_v59 = vld [vmem:[%s947_s0 + $0x1d0] sm:$0xff] }
   0xe   :  { %593 = vmatpush3.bf16.msra.mxu1 %v592_v34  ;;  %v37_v56 = vld [vmem:[%s947_s0 + $0x40] sm:$0xff]  ;;  %v38_v58 = vld [vmem:[%s947_s0 + $0x48] sm:$0xff]  ;;  %v88_v60 = vld [vmem:[%s947_s0 + $0x1d8] sm:$0xff]  ;;  %v600_v0 = vpack.c.bf16 %v70_v55, %v69_v54 }
   0xf   :  { %561 = vmatpush3.bf16.msra.mxu0 %v560_v38  ;;  %595 = vmatprep.subr.bf16.mxu1 %v594_v39  ;;  %v55_v62 = vld [vmem:[%s947_s0 + $0xd0] sm:$0xff]  ;;  %v56_v63 = vld [vmem:[%s947_s0 + $0xd8] sm:$0xff]  ;;  %v568_v1 = vpack.c.bf16 %v38_v58, %v37_v56  ;;  %v602_v2 = vpack.c.bf16 %v88_v60, %v87_v59  ;;  %v89_v8 = vld [vmem:[%s947_s0 + $0x1e0] sm:$0xff] }
  0x10   :  { %563 = vmatprep.subr.bf16.mxu0 %v562_v43  ;;  %v71_v3 = vld [vmem:[%s947_s0 + $0x150] sm:$0xff]  ;;  %v72_v4 = vld [vmem:[%s947_s0 + $0x158] sm:$0xff]  ;;  %v570_v6 = vpack.c.bf16 %v56_v63, %v55_v62  ;;  %v90_v9 = vld [vmem:[%s947_s0 + $0x1e8] sm:$0xff] }
  0x11   :  { %v39_v5 = vld [vmem:[%s947_s0 + $0x50] sm:$0xff]  ;;  %v40_v7 = vld [vmem:[%s947_s0 + $0x58] sm:$0xff]  ;;  %v57_v11 = vld [vmem:[%s947_s0 + $0xe0] sm:$0xff]  ;;  %v604_v13 = vpack.c.bf16 %v72_v4, %v71_v3  ;;  %v606_v17 = vpack.c.bf16 %v90_v9, %v89_v8 }
  0x12   :  { %597 = vmatpush3.bf16.msra.mxu1 %v596_v51  ;;  %v58_v12 = vld [vmem:[%s947_s0 + $0xe8] sm:$0xff]  ;;  %v73_v14 = vld [vmem:[%s947_s0 + $0x160] sm:$0xff]  ;;  %v572_v16 = vpack.c.bf16 %v40_v7, %v39_v5  ;;  %v91_v22 = vld [vmem:[%s947_s0 + $0x1f0] sm:$0xff] }
  0x13   :  { %565 = vmatpush3.bf16.msra.mxu0 %v564_v52  ;;  %599 = vmatprep.subr.bf16.mxu1 %v598_v53  ;;  %v74_v15 = vld [vmem:[%s947_s0 + $0x168] sm:$0xff]  ;;  %v41_v18 = vld [vmem:[%s947_s0 + $0x60] sm:$0xff]  ;;  %v574_v21 = vpack.c.bf16 %v58_v12, %v57_v11  ;;  %v92_v23 = vld [vmem:[%s947_s0 + $0x1f8] sm:$0xff] }
  0x14   :  { %567 = vmatprep.subr.bf16.mxu0 %v566_v57  ;;  %v42_v19 = vld [vmem:[%s947_s0 + $0x68] sm:$0xff]  ;;  %v93_v20 = vld [vmem:[%s948_s1] sm:$0x3] }
  0x15   :  { %v102_v24 = vrot.slane %v93_v20, %v101_v10 }
  0x16   :  { %601 = vmatpush3.bf16.msra.mxu1 %v600_v0 }
  0x17   :  { %569 = vmatpush3.bf16.msra.mxu0 %v568_v1  ;;  %603 = vmatprep.subr.bf16.mxu1 %v602_v2 }
  0x18   :  { %571 = vmatprep.subr.bf16.mxu0 %v570_v6 }
  0x19   :  { %14 = vsyncpa [#allocation5], 0  ;;  %v59_v25 = vld [vmem:[%s947_s0 + $0xf0] sm:$0xff]  ;;  %v60_v26 = vld [vmem:[%s947_s0 + $0xf8] sm:$0xff]  ;;  %v608_v27 = vpack.c.bf16 %v74_v15, %v73_v14  ;;  %239 = vmatprep.mubr.f32.mxu1 %v102_v24  ;;  %v576_v28 = vpack.c.bf16 %v42_v19, %v41_v18  ;;  %v610_v29 = vpack.c.bf16 %v92_v23, %v91_v22  ;;  %169 = vmatprep.mubr.f32.mxu0 %v102_v24  ;;  %v97_v35 = vsub.s32 0, %v826_v61  ;;  %s659_s12 = smov [#allocation4]  }
  0x1a   :  { %605 = vmatpush3.bf16.msra.mxu1 %v604_v13  ;;  %v75_v30 = vld [vmem:[%s947_s0 + $0x170] sm:$0xff]  ;;  %v76_v31 = vld [vmem:[%s947_s0 + $0x178] sm:$0xff]  ;;  %v578_v32 = vpack.c.bf16 %v60_v26, %v59_v25  ;;  %v251_v38 = vld [vmem:[%s949_s2] sm:$0xff]  ;;  %v656_v42 = vmov 0.0|0.0   ;;  %vm657_vm0 = vmmov 0   ;;  %v658_v52 = vmov 0.0  }
  0x1b   :  { %573 = vmatpush3.bf16.msra.mxu0 %v572_v16  ;;  %607 = vmatprep.subr.bf16.mxu1 %v606_v17  ;;  %v43_v33 = vld [vmem:[%s947_s0 + $0x70] sm:$0xff]  ;;  %v44_v34 = vld [vmem:[%s947_s0 + $0x78] sm:$0xff]  ;;  %v612_v36 = vpack.c.bf16 %v76_v31, %v75_v30  ;;  %v252_v39 = vld [vmem:[%s949_s2 + $0x8] sm:$0xff]  ;;  %v98_v40 = vrot.slane %v93_v20, %v97_v35  ;;  %v246_v56 = vstv %s952_s5  ;;  %vm269_vm1 = vcmask 1041409  }
  0x1c   :  { %575 = vmatprep.subr.bf16.mxu0 %v574_v21  ;;  %v580_v37 = vpack.c.bf16 %v44_v34, %v43_v33  ;;  %v615_v41 = vpack.c.bf16 %v252_v39, %v251_v38  ;;  %v253_v43 = vld [vmem:[%s949_s2 + $0x10] sm:$0xff]  ;;  %v254_v44 = vld [vmem:[%s949_s2 + $0x18] sm:$0xff]  ;;  %v255_v46 = vld [vmem:[%s949_s2 + $0x20] sm:$0xff]  ;;  %vm271_vm2 = vcmask 523264   ;;  %v347_v8 = vstv %s953_s6 }
  0x1d   :  { %v618_v45 = vpack.c.bf16 %v254_v44, %v253_v43  ;;  %v256_v47 = vld [vmem:[%s949_s2 + $0x28] sm:$0xff]  ;;  %v257_v49 = vld [vmem:[%s949_s2 + $0x30] sm:$0xff]  ;;  %v258_v50 = vld [vmem:[%s949_s2 + $0x38] sm:$0xff]  ;;  %vm425_vm3 = vcmask 8192  }
  0x1e   :  { %609 = vmatpush3.bf16.msra.mxu1 %v608_v27  ;;  %v621_v48 = vpack.c.bf16 %v256_v47, %v255_v46  ;;  %v624_v51 = vpack.c.bf16 %v258_v50, %v257_v49  ;;  %v441_v2 = vld [vmem:[%s950_s3] ss:$0 sm:$0xff]  ;;  %s433_s3 = sshll.u32 %s659_s12, 4  ;;  %s434_s3 = int_to_ptr.vmem [resolvable:$true] %s433_s3 }
  0x1f   :  { %577 = vmatpush3.bf16.msra.mxu0 %v576_v28  ;;  %611 = vmatprep.subr.bf16.mxu1 %v610_v29  ;;  %v345_v7 = vld [vmem:[%s951_s4] sm:$0x1]  ;;  %s632_s13 = scalar_lea.vmem %s434_s3, 16  ;;  %s636_s14 = scalar_lea.vmem %s434_s3, 32 }
  0x20   :  { %579 = vmatprep.subr.bf16.mxu0 %v578_v32  ;;  %p633_p0 = scmp.ne.s32.totalorder %s434_s3, %s632_s13  ;;  %p637_p1 = scmp.lt.s32.totalorder %s434_s3, %s434_s3 }
  0x21   :  { %p638_p2 = scmp.lt.s32.totalorder %s636_s14, %s632_s13 }
  0x22   :  { %613 = vmatpush3.bf16.msra.mxu1 %v612_v36 }
  0x23   :  { %581 = vmatpush3.bf16.msra.mxu0 %v580_v37  ;;  %545 = vmatprep.subr.mxu1 %v658_v52  ;;  %p639_p3 = por %p638_p2, %p637_p1 }
  0x24   :  { %614 = vmatprep.subr.bf16.mxu0 %v656_v42 }
  0x25   :  { %240 = vmatmul.mubr.f32.vlgmr.msra.gmra.mrb[0].mxu1 %v98_v40  ;;  %p640_p4 = pnand %p639_p3, %p633_p0 }
  0x26   :  { %170 = vmatmul.mubr.f32.vlgmr.msra.gmra.mrb[0].mxu0 %v98_v40  ;;  %547 = vmatprep.mubr.msk.f32.mxu1 %vm657_vm0, %v658_v52 }
  0x27   :  { %616 = vmatpush3.bf16.msra.mxu0 %v615_v41  ;;  %542 = vmatprep.mubr.msk.f32.mxu0 %vm657_vm0, %v658_v52 }
  0x28   :  { %617 = vmatprep.subr.bf16.mxu0 %v656_v42 }
  0x2b   :  { %619 = vmatpush3.bf16.msra.mxu0 %v618_v45 }
  0x2c   :  { %620 = vmatprep.subr.bf16.mxu0 %v656_v42 }
  0x2f   :  { %622 = vmatpush3.bf16.msra.mxu0 %v621_v48 }
  0x30   :  { %623 = vmatprep.subr.bf16.mxu0 %v656_v42 }
  0x33   :  { %625 = vmatpush3.bf16.msra.mxu0 %v624_v51 }
  0xf8   :  { %v512_v53 = vpop.f32.mrb[0].mxu1 }
  0xf9   :  { %v477_v54 = vpop.f32.mrb[0].mxu0  ;;  %v513_v55 = vpop.f32.mrb[1].mxu1 }
  0xfa   :  { %v514_v57 = vadd.f32 %v513_v55, %v512_v53  ;;  %v478_v58 = vpop.f32.mrb[1].mxu0 }
  0xfb   :  { %v479_v59 = vadd.f32 %v478_v58, %v477_v54 }
  0xfc   :  { %v248_v60 = vadd.f32 %v514_v57, %v246_v56 }
  0xfd   :  { %v247_v61 = vadd.f32 %v479_v59, %v246_v56 }
  0xfe   :  { %v250_v62 = vmax.f32 %v248_v60, 0.0 }
  0xff   :  { %v249_v63 = vmax.f32 %v247_v61, 0.0 }
 0x100   :  { %v268_v0 = vrot.slane %v250_v62, 7 }
 0x102   :  { %v270_v1 = vsel %vm269_vm1, %v268_v0, %v249_v63 }
 0x103   :  { %543 = vmatmul.mubr.msk.f32.vlgmr.msra.gmra.mrb[2].mxu0 %vm271_vm2, %v270_v1 }
 0x1d6   :  { %v340_v3 = vpop.f32.mrb[2].mxu0 }
 0x1d7   :  { %v341_v4 = vadd.f32 %v441_v2, %v340_v3  ;;  %v544_v5 = vpop.f32.mrb[3].mxu0 }
 0x1d9   :  { %v344_v6 = vmax.f32 %v341_v4, 0.0 }
 0x1db   :  { %546 = vmatpush3.xpose.msk.msra.mxu1 %vm271_vm2, %v344_v6 }
 0x1de   :  { %548 = vmatmul.mubr.msk.f32.vlgmr.msra.gmra.mrb[2].mxu1 %vm271_vm2, %v345_v7 }
 0x2b1   :  { %v420_v9 = vpop.f32.mrb[2].mxu1 }
 0x2b2   :  { %v421_v10 = vadd.f32 %v420_v9, %v347_v8  ;;  %v549_v11 = vpop.f32.mrb[3].mxu1 }
 0x2b4   :  { %630 = vtanh.f32 %v421_v10 }
 0x2be   :  { %v631_v12 = vpop.eup %630 }
 0x2bf   :  { %426 = vst.msk [vmem:[#allocation4] sm:$0x1] %vm425_vm3, %v631_v12 }
 0x2c0   :  { %643 = shalt.err (!%p640_p4)
}
 0x2c1   :  { %s644_s15 = scalar_lea.hbm %s954_s7, 16 }
 0x2c2   :  { %p645_p5 = scmp.ne.s32.totalorder %s954_s7, %s644_s15  ;;  %p648_p6 = scmp.lt.u32.totalorder %s644_s15, %s954_s7 }
 0x2c4   :  { %p650_p7 = pnand %p648_p6, %p645_p5 }
 0x2c6   :  { %653 = shalt.err (!%p650_p7)
}
 0x2c7   :  { %436 = dma.vmem_to_hbm [thread:$0]  %s434_s3, 16, %s954_s7, [#allocation5]  }
 0x2c8   :  { %654 = dma.done.wait [#allocation5], 16  }
 0x2c9   :  { %655 = vsyncadd [#allocation5], 4294967280 }
 0x2ca   :  { %440 = vsyncpa [#allocation5], 1 }

</bundles_post_ra>
